<compile_context>
chip_gen: v5e
topology: v5e:2x2
jax: 0.10.0
libtpu: 0.0.40
codegen_flags: <defaults>
</compile_context>

<pallas_src>
import functools
import math

import jax
import jax.numpy as jnp
from jax.experimental import pallas as pl
from jax.experimental.pallas import tpu as pltpu


def _project_readout_kernel(x_ref, w_ref, b2_ref, o_ref, *,
                            row_start, rows, compute_dtype, gelu_approximate):
    # x_ref : (Sx, C)   token slab/tile (raw or pre-cast dtype)
    # w_ref : (C, C)    patch half of W.T in compute dtype (VMEM resident)
    # b2_ref: (1, C)    fused per-batch bias = x[b,0] @ W_readout.T + bias (f32)
    # o_ref : (rows, C) output tile
    if row_start == 0 and rows == x_ref.shape[0]:
        xs = x_ref[...]
    else:
        # start_index offset applied in-kernel (static slice; no wrapper copy).
        xs = x_ref[pl.ds(row_start, rows), :]
    xs = xs.astype(compute_dtype)
    y = jnp.dot(xs, w_ref[...], preferred_element_type=jnp.float32)
    y = y + b2_ref[...]                       # (1, C) broadcast over rows
    y = jax.nn.gelu(y, approximate=gelu_approximate)
    o_ref[...] = y.astype(o_ref.dtype)


def project_readout(x, weight, bias, start_index=1, *,
                    compute_dtype=jnp.bfloat16,
                    out_dtype=None,
                    gelu_approximate=None,
                    tm=512,
                    force_token_tiling=False,
                    vmem_budget_bytes=40 << 20):
    """ProjectReadout forward.

    x:      (B, S, C)
    weight: (C, 2C)  PyTorch Linear layout (out_features, in_features)
    bias:   (C,)
    compute_dtype: dtype fed to the MXU (default bf16; None -> x.dtype).
    out_dtype:     output dtype (None -> x.dtype; bf16 halves writeback bytes).
    gelu_approximate: None -> tanh GELU for bf16 compute, exact erf for f32.
    """
    B, S, C = x.shape
    assert weight.shape == (C, 2 * C)
    assert bias.shape == (C,)
    S_out = S - start_index
    cdt = jnp.dtype(x.dtype if compute_dtype is None else compute_dtype)
    odt = jnp.dtype(x.dtype if out_dtype is None else out_dtype)
    if gelu_approximate is None:
        # bf16 path: tanh GELU (EUP, cheap); f32 path: exact erf for torch parity.
        gelu_approximate = cdt != jnp.dtype(jnp.float32)

    # --- One-time parameter prep (tiny XLA ops, hoisted in a real model). ----
    w_patch_t = weight[:, :C].T.astype(cdt)            # (C, C) patch half of W.T
    w_read_t = weight[:, C:].T.astype(jnp.float32)     # (C, C) readout half of W.T
    cls = x[:, 0, :].astype(jnp.float32)               # (B, C)
    bias2 = (cls @ w_read_t + bias.astype(jnp.float32)).reshape(B, 1, C)

    xb = x.dtype.itemsize
    cb = cdt.itemsize
    ob = odt.itemsize

    # Rough double-buffered working set for the per-batch path (+ f32 temps).
    batch_est = (2 * S * C * xb + 2 * S_out * C * ob + 2 * C * C * cb
                 + 2 * C * 4 + 3 * S_out * C * 4)
    # Per-batch blocks need >= 2 grid steps (pipelining / v7x megacore balance).
    use_batch_blocks = ((not force_token_tiling) and B >= 2
                        and batch_est <= vmem_budget_bytes)

    if use_batch_blocks:
        # Primary path: raw x slab per batch, offset + cast done in-kernel.
        grid = (B,)
        kernel = functools.partial(
            _project_readout_kernel, row_start=start_index, rows=S_out,
            compute_dtype=cdt, gelu_approximate=gelu_approximate)
        in_specs = [
            pl.BlockSpec((None, S, C), lambda b: (b, 0, 0)),       # raw tokens
            pl.BlockSpec((C, C), lambda b: (0, 0)),                # resident weight
            pl.BlockSpec((None, 1, C), lambda b: (b, 0, 0)),       # fused bias
        ]
        out_specs = pl.BlockSpec((None, S_out, C), lambda b: (b, 0, 0))
        dims = ("parallel",)
        operands = (x, w_patch_t, bias2)
        vmem_est = batch_est
    else:
        # Fallback: token-tiled with balanced TM (avoids near-empty tail tile).
        x_patch = x[:, start_index:, :].astype(cdt)                # (B, S_out, C)
        n_t = -(-S_out // tm)
        if n_t <= 1:
            TM = S_out
        else:
            TM = -(-S_out // n_t)
            TM = -(-TM // 8) * 8                                   # sublane multiple
            if TM >= S_out:
                TM = S_out
        grid = (B, -(-S_out // TM))
        kernel = functools.partial(
            _project_readout_kernel, row_start=0, rows=TM,
            compute_dtype=cdt, gelu_approximate=gelu_approximate)
        in_specs = [
            pl.BlockSpec((None, TM, C), lambda b, t: (b, t, 0)),   # patch tokens
            pl.BlockSpec((C, C), lambda b, t: (0, 0)),             # resident weight
            pl.BlockSpec((None, 1, C), lambda b, t: (b, 0, 0)),    # fused bias
        ]
        out_specs = pl.BlockSpec((None, TM, C), lambda b, t: (b, t, 0))
        dims = ("parallel", "parallel")
        operands = (x_patch, w_patch_t, bias2)
        vmem_est = (2 * TM * C * cb + 2 * TM * C * ob + 2 * C * C * cb
                    + 2 * C * 4 + 3 * TM * C * 4)

    # Valid on all generations: >= default scoped limits, <= v7x physical VMEM.
    vmem_limit = int(min(max(vmem_est + (4 << 20), 32 << 20), 64 << 20))

    return pl.pallas_call(
        kernel,
        out_shape=jax.ShapeDtypeStruct((B, S_out, C), odt),
        grid_spec=pltpu.PrefetchScalarGridSpec(
            num_scalar_prefetch=0,
            grid=grid,
            in_specs=in_specs,
            out_specs=out_specs,
        ),
        compiler_params=pltpu.CompilerParams(
            dimension_semantics=dims,
            vmem_limit_bytes=vmem_limit,
        ),
    )(*operands)


def _reference(x, weight, bias, start_index=1):
    patch = x[:, start_index:]                              # (B, S-s, C)
    readout = jnp.broadcast_to(x[:, 0:1], patch.shape)      # (B, S-s, C)
    features = jnp.concatenate([patch, readout], axis=-1)   # (B, S-s, 2C)
    y = jnp.einsum("bsk,ck->bsc", features, weight) + bias
    return jax.nn.gelu(y, approximate=False)


if __name__ == "__main__":
    start_index = 1
    key = jax.random.PRNGKey(0)
    kx, kw, kb, kx2 = jax.random.split(key, 4)

    # Config 1: B=2, S=8 (incl. CLS), C=32.
    B, S, C = 2, 8, 32
    x = jax.random.normal(kx, (B, S, C), dtype=jnp.float32)
    bound = 1.0 / math.sqrt(2 * C)
    weight = jax.random.uniform(kw, (C, 2 * C), jnp.float32, -bound, bound)
    bias = jax.random.uniform(kb, (C,), jnp.float32, -bound, bound)
    ref = _reference(x, weight, bias, start_index)

    # 1) Default fast path: bf16 MXU compute, tanh GELU, per-batch blocks
    #    (no wrapper slice/cast; offset applied in-kernel).
    out = jax.block_until_ready(project_readout(x, weight, bias, start_index))
    assert out.shape == (B, S - start_index, C) and out.dtype == x.dtype
    assert jnp.allclose(out, ref, atol=5e-2, rtol=5e-2), "bf16 default mismatch"

    # 2) Exact-parity path: f32 compute + exact-erf GELU, forced token-tiled.
    out_f32 = jax.block_until_ready(
        project_readout(x, weight, bias, start_index,
                        compute_dtype=jnp.float32, force_token_tiling=True))
    assert jnp.allclose(out_f32, ref, atol=1e-5, rtol=1e-5), "f32 mismatch"

    # 3) bf16 output writeback (downstream consumer accepts bf16).
    out_bf16 = jax.block_until_ready(
        project_readout(x, weight, bias, start_index, out_dtype=jnp.bfloat16))
    assert out_bf16.dtype == jnp.bfloat16
    assert jnp.allclose(out_bf16.astype(jnp.float32), ref, atol=5e-2, rtol=5e-2)

    # Config 2: B=1, S=30 -> multi-tile token-tiled fallback (B=1 auto-tiles),
    # balanced TM=16 with a padded trailing tile (masked stores).
    B2, S2 = 1, 30
    x2 = jax.random.normal(kx2, (B2, S2, C), dtype=jnp.float32)
    ref2 = _reference(x2, weight, bias, start_index)
    out2 = jax.block_until_ready(
        project_readout(x2, weight, bias, start_index,
                        compute_dtype=jnp.float32, tm=16))
    assert out2.shape == (B2, S2 - start_index, C)
    assert jnp.allclose(out2, ref2, atol=1e-5, rtol=1e-5), "tiled-path mismatch"

    print("KERNEL_OK")
</pallas_src>

<mosaic_0001>
module attributes {stable_mosaic.version = 11 : i64} {
  func.func @_project_readout_kernel(%arg0: i32, %arg1: memref<1x8x32xf32, #tpu.memory_space<vmem>>, %arg2: memref<32x32xbf16, #tpu.memory_space<vmem>>, %arg3: memref<1x1x32xf32, #tpu.memory_space<vmem>>, %arg4: memref<1x7x32xf32, #tpu.memory_space<vmem>>) attributes {dimension_semantics = [#tpu.dimension_semantics<parallel>], iteration_bounds = array<i64: 2>, scalar_prefetch = 0 : i64, scratch_operands = 0 : i64, tpu.core_type = #tpu.core_type<tc>, window_params = [{transform_indices = @transform_0, window_bounds = array<i64: 1, 8, 32>}, {pipeline_mode = #tpu.pipeline_mode<synchronous>, transform_indices = @transform_1, window_bounds = array<i64: 32, 32>}, {transform_indices = @transform_2, window_bounds = array<i64: 1, 1, 32>}, {transform_indices = @transform_3, window_bounds = array<i64: 1, 7, 32>}]} {
    %c0 = arith.constant 0 : index
    %c1 = arith.constant 1 : index
    %c0_0 = arith.constant 0 : index
    %0 = vector.load %arg1[%c0, %c1, %c0_0] : memref<1x8x32xf32, #tpu.memory_space<vmem>>, vector<1x7x32xf32>
    %1 = vector.shape_cast %0 : vector<1x7x32xf32> to vector<7x32xf32>
    %2 = arith.truncf %1 : vector<7x32xf32> to vector<7x32xbf16>
    %c0_1 = arith.constant 0 : index
    %c0_2 = arith.constant 0 : index
    %3 = vector.load %arg2[%c0_1, %c0_2] : memref<32x32xbf16, #tpu.memory_space<vmem>>, vector<32x32xbf16>
    %cst = arith.constant dense<0.000000e+00> : vector<7x32xf32>
    %4 = tpu.matmul %2, %3, %cst {dimension_numbers = #tpu.dot_dimension_numbers<[1], [0], [0], [1], [0, 0, 1, 1], [], []>} : vector<7x32xbf16>, vector<32x32xbf16>, vector<7x32xf32> -> vector<7x32xf32>
    %c0_3 = arith.constant 0 : index
    %c0_4 = arith.constant 0 : index
    %c0_5 = arith.constant 0 : index
    %5 = vector.load %arg3[%c0_3, %c0_4, %c0_5] : memref<1x1x32xf32, #tpu.memory_space<vmem>>, vector<1x1x32xf32>
    %6 = vector.shape_cast %5 : vector<1x1x32xf32> to vector<1x32xf32>
    %7 = vector.broadcast %6 : vector<1x32xf32> to vector<7x32xf32>
    %8 = arith.addf %4, %7 : vector<7x32xf32>
    %9 = arith.mulf %8, %8 : vector<7x32xf32>
    %10 = arith.mulf %8, %9 : vector<7x32xf32>
    %cst_6 = arith.constant 4.471500e-02 : f32
    %11 = vector.broadcast %cst_6 : f32 to vector<7x32xf32>
    %12 = arith.mulf %11, %10 : vector<7x32xf32>
    %13 = arith.addf %8, %12 : vector<7x32xf32>
    %cst_7 = arith.constant 0.797884583 : f32
    %14 = vector.broadcast %cst_7 : f32 to vector<7x32xf32>
    %15 = arith.mulf %14, %13 : vector<7x32xf32>
    %16 = math.tanh %15 : vector<7x32xf32>
    %cst_8 = arith.constant 1.000000e+00 : f32
    %17 = vector.broadcast %cst_8 : f32 to vector<7x32xf32>
    %18 = arith.addf %17, %16 : vector<7x32xf32>
    %cst_9 = arith.constant 5.000000e-01 : f32
    %19 = vector.broadcast %cst_9 : f32 to vector<7x32xf32>
    %20 = arith.mulf %19, %18 : vector<7x32xf32>
    %21 = arith.mulf %8, %20 : vector<7x32xf32>
    %c0_10 = arith.constant 0 : index
    %c0_11 = arith.constant 0 : index
    %c0_12 = arith.constant 0 : index
    %22 = vector.load %arg4[%c0_10, %c0_11, %c0_12] : memref<1x7x32xf32, #tpu.memory_space<vmem>>, vector<1x7x32xf32>
    %23 = vector.shape_cast %22 : vector<1x7x32xf32> to vector<7x32xf32>
    %24 = vector.shape_cast %21 : vector<7x32xf32> to vector<1x7x32xf32>
    tpu.vector_store %arg4[%c0_10, %c0_11, %c0_12], %24 {strides = array<i32>} : memref<1x7x32xf32, #tpu.memory_space<vmem>>, vector<1x7x32xf32>,
    return
  }
  func.func @transform_0(%arg0: i32) -> (i32, i32, i32) {
    %c0_i32 = arith.constant 0 : i32
    %c0_i32_0 = arith.constant 0 : i32
    %c0_i32_1 = arith.constant 0 : i32
    return %arg0, %c0_i32, %c0_i32_0 : i32, i32, i32
  }
  func.func @transform_1(%arg0: i32) -> (i32, i32) {
    %c0_i32 = arith.constant 0 : i32
    %c0_i32_0 = arith.constant 0 : i32
    %c0_i32_1 = arith.constant 0 : i32
    return %c0_i32, %c0_i32_0 : i32, i32
  }
  func.func @transform_2(%arg0: i32) -> (i32, i32, i32) {
    %c0_i32 = arith.constant 0 : i32
    %c0_i32_0 = arith.constant 0 : i32
    %c0_i32_1 = arith.constant 0 : i32
    return %arg0, %c0_i32, %c0_i32_0 : i32, i32, i32
  }
  func.func @transform_3(%arg0: i32) -> (i32, i32, i32) {
    %c0_i32 = arith.constant 0 : i32
    %c0_i32_0 = arith.constant 0 : i32
    %c0_i32_1 = arith.constant 0 : i32
    return %arg0, %c0_i32, %c0_i32_0 : i32, i32, i32
  }
}

</mosaic_0001>

<bundles_post_ra>
// kernel: tpu_custom_call.1
= control target key start
LH: loop header
LB: loop body
LE: loop exit
PB: predicated region body
PF: predicated region fallthrough
CT: control target
= control target key end

     0   :  { %8 = vsyncpa [#allocation3], 0  ;;  %s762_s0 = inlined_call_operand.hbm [shape: f32[2,8,32], index: 0, kind: input, shape index: {}]   ;;  %s763_s1 = inlined_call_operand.hbm [shape: bf16[32,32], index: 1, kind: input, shape index: {}]   ;;  %s764_s2 = inlined_call_operand.hbm [shape: f32[2,1,32], index: 2, kind: input, shape index: {}]   ;;  %s765_s3 = inlined_call_operand.vmem [shape: f32[2,7,32], index: 3, kind: output, shape index: {}]  }
   0x1   :  { %10 = vsyncpa [#allocation3 + $0x1], 0 }
   0x2   :  { %11 = vsyncpa [#allocation5], 0  ;;  %s619_s12 = smov 0   ;;  %s621_s13 = smov 0  }
   0x3   :  { %s623_s14 = smov 0   ;;  %s625_s15 = smov 0  }
   0x4 LB: > { %s640_s16 = sadd.s32 1, %s594_s15   ;;  %s24_s17 = sadd.s32 1, %s590_s14  ;;  %s594_s15 = sphi %s625_s15, %s772_s15   ;;  %s590_s14 = sphi %s623_s14, %s771_s14   ;;  %s586_s13 = sphi %s621_s13, %s770_s13   ;;  %s582_s12 = sphi %s619_s12, %s769_s12  }
   0x5   : > { %s21_s18 = ssub.s32 %s594_s15, %s640_s16  ;;  %p31_p0 = scmp.ne.s32.totalorder %s590_s14, %s586_s13 }
   0x6   : > { %p22_p1 = scmp.eq.s32.totalorder %s21_s18, 0  ;;  %p32_p2 = scmp.eq.s32.totalorder %s594_s15, 0 }
   0x7   : > { %p37_p3 = scmp.ne.s32.totalorder %s586_s13, %s582_s12  ;;  %p422_p5 = scmp.lt.s32.totalorder %s594_s15, 2 }
   0x8   : > { %s651_s19 = scalar_select %p22_p1, %s590_s14, %s24_s17  }
   0x9   : > { %p33_p4 = por %p32_p2, %p31_p0  ;;  %s148_s20 = sand.u32 1, %s594_s15  }
   0xa   : > { %s150_s21 = sand.u32 1, %s590_s14   ;;  %s384_s23 = sshll.u32 %s594_s15, 3 }
   0xb   : > { %s383_s22 = sshll.u32 %s150_s21, 3  ;;  %s156_s26 = scalar_lea.hbm %s762_s0, %s384_s23 }
   0xc   : > { %s152_s27 = scalar_lea.vmem [#allocation2], %s383_s22  ;;  %s158_s29 = sshll.u32 %s156_s26, 4  ;;  %s159_s29 = int_to_ptr.hbm [resolvable:$true] %s158_s29 }
   0xd   : > { %s160_s28 = sshll.u32 %s152_s27, 4  ;;  %p662_p6 = pnand %p422_p5, %p33_p4  ;;  %s161_s28 = int_to_ptr.vmem [resolvable:$true] %s160_s28 }
   0xe   : > { %s667_s4 = sadd.s32 4294967295, %s594_s15   ;;  %p380_p7 = scmp.ge.s32.totalorder %s594_s15, 1 }
   0xf   : > { %p38_p8 = scmp.eq.s32.totalorder %s667_s4, 0  ;;  %s671_s5 = scalar_lea.sflag [#allocation3], %s148_s20 }
  0x10   : > { %s462_s6 = sshra.s32 %s159_s29, 4  ;;  %p466_p10 = pneg %p662_p6  ;;  %s463_s6 = int_to_ptr.hbm [resolvable:$true] %s462_s6 }
  0x11   : > { %s464_s7 = scalar_lea.hbm %s463_s6, 8  ;;  %s469_s10 = scalar_lea.hbm %s762_s0, 16 }
  0x12   : > { %p465_p9 = scmp.ne.s32.totalorder %s463_s6, %s464_s7  ;;  %p470_p13 = scmp.lt.s32.totalorder %s463_s6, %s762_s0 }
  0x13   : > { %p471_p0 = scmp.lt.s32.totalorder %s469_s10, %s464_s7 }
  0x14   : > { %p467_p11 = pnand %p466_p10, %p465_p9 }
  0x15   : > { %p472_p1 = por %p471_p0, %p470_p13 }
  0x16   : > { %p468_p12 = pneg %p467_p11 }
  0x18   : > { %p473_p2 = pnand %p472_p1, %p468_p12 }
  0x1a   : > { %476 = shalt.err (!%p473_p2)
}
  0x1b   : > { %417 = dma.hbm_to_vmem [thread:$0]  (!%p662_p6), %s159_s29, 128, %s161_s28, %s671_s5  }
  0x1c   : > { %p692_p4 = por %p38_p8, %p37_p3  ;;  %p121_p5 = scmp.lt.s32.totalorder %s594_s15, 3 }
  0x1d   : > { %s132_s23 = sshll.u32 %s763_s1, 4  ;;  %s596_s12 = smov [#allocation4]   ;;  %s133_s23 = int_to_ptr.hbm [resolvable:$true] %s132_s23 }
  0x1e   : > { %p702_p9 = pnand %p380_p7, %p121_p5  ;;  %s134_s25 = sshll.u32 %s596_s12, 4  ;;  %s135_s25 = int_to_ptr.vmem [resolvable:$true] %s134_s25 }
  0x1f   : > { %s173_s28 = scalar_lea.hbm %s764_s2, %s594_s15  ;;  %s170_s29 = scalar_lea.vmem [#allocation6], %s150_s21 }
  0x20   : > { %p410_p11 = pneg %p702_p9  ;;  %s177_s6 = sshll.u32 %s170_s29, 4  ;;  %s178_s6 = int_to_ptr.vmem [resolvable:$true] %s177_s6 }
  0x21   : > { %s175_s7 = sshll.u32 %s173_s28, 4  ;;  %s597_s8 = smov 64   ;;  %s176_s7 = int_to_ptr.hbm [resolvable:$true] %s175_s7 }
  0x22   : > { %p411_p3 = pnand %p410_p11, %p38_p8  ;;  %s598_s9 = smov 4  }
  0x23   : > { %s522_s10 = sshra.s32 %s176_s7, 4  ;;  %s529_s15 = scalar_lea.hbm %s764_s2, 2  ;;  %s523_s10 = int_to_ptr.hbm [resolvable:$true] %s522_s10 }
  0x24   : > { %413 = dma.hbm_to_vmem [thread:$0]  (!%p411_p3), %s133_s23, 256, %s135_s25, [#allocation5], %s597_s8, %s597_s8, %s598_s9  }
  0x25   : > { %s524_s11 = scalar_lea.hbm %s523_s10, 1  ;;  %p530_p0 = scmp.lt.s32.totalorder %s523_s10, %s764_s2 }
  0x26   : > { %p525_p7 = scmp.ne.s32.totalorder %s523_s10, %s524_s11  ;;  %p531_p1 = scmp.lt.s32.totalorder %s529_s15, %s524_s11 }
  0x28   : > { %p527_p12 = pnand %p525_p7, %p466_p10  ;;  %p532_p2 = por %p531_p1, %p530_p0 }
  0x2a   : > { %p528_p13 = pneg %p527_p12 }
  0x2c   : > { %p533_p5 = pnand %p532_p2, %p528_p13 }
  0x2e   : > { %536 = shalt.err (!%p533_p5)
}
  0x2f   : > { %420 = dma.hbm_to_vmem [thread:$0]  (!%p662_p6), %s176_s7, 16, %s178_s6, %s671_s5  }
  0x30   : > { %186 = sbr.rel (%p702_p9) target bundleno = 218 (0xda), region = 32  ;;  %s188_s23 = sand.u32 (!%p702_p9), 1, %s667_s4  }
  0x31   : > { %s190_s12 = sand.u32 (!%p702_p9), 1, %s586_s13   ;;  %s189_s26 = scalar_lea.sflag (!%p702_p9), [#allocation3], %s188_s23 }
  0x32   : > { %s386_s25 = sshll.u32 (!%p702_p9), %s190_s12, 3 }
  0x33   : > { %s192_s27 = scalar_lea.vmem (!%p702_p9), [#allocation2], %s386_s25 }
  0x35   : > { %569 = dma.done.wait (%p692_p4), %s189_s26, 128  }
  0x36   : > { %571 = vsyncadd (%p692_p4), %s189_s26, 4294967168 }
  0x37   : > { %573 = dma.done.wait (%p38_p8), [#allocation5], 256  }
  0x38   : > { %575 = vsyncadd (%p38_p8), [#allocation5], 4294967040  ;;  %s206_s30 = scalar_lea.vmem [#allocation6], %s190_s12 }
  0x39   : > { %577 = dma.done.wait (%p692_p4), %s189_s26, 16  }
  0x3a   : > { %579 = vsyncadd (%p692_p4), %s189_s26, 4294967280  ;;  %v401_v0 = vld [vmem:[#allocation4 + $0x8] sm:$0xff]  ;;  %v400_v1 = vld [vmem:[#allocation4] sm:$0xff]  ;;  %vm260_vm0 = vcmask 261120   ;;  %p233_p6 = scmp.lt.s32.totalorder %s667_s4, 1  ;;  %vm286_vm1 = vcmask 260096  }
  0x3b   : > { %270 = vmatpush.bf16.msra.mxu0 %v401_v0  ;;  %v238_v2 = vld [vmem:[%s192_s27 + $0x1] sm:$0x7f]  ;;  %v459_v4 = vld [vmem:[%s206_s30] ss:$0 sm:$0xff] }
  0x3c   : > { %v239_v3 = vpack.c.bf16 %v238_v2, %v238_v2  ;;  %s774_s4 = smov (!%p233_p6, %s667_s4), 1 }
  0x3d   : > { %s388_s5 = sshll.u32 %s774_s4, 3 }
  0x3e   : > { %s236_s28 = scalar_lea.vmem %s765_s3, %s388_s5 }
  0x3f   : > { %271 = vmatpush.bf16.msra.mxu0 %v400_v1 }
  0x42   : > { %397 = vmatmul.msk.bf16.vlgmr.msra.gmra.mxu0 %vm260_vm0, %v239_v3 }
  0xbf   : > { %v273_v5 = vpop.f32.mrf.mxu0 }
  0xc0   : > { %v274_v6 = vadd.f32 %v459_v4, %v273_v5 }
  0xc2   : > { %v277_v7 = vmul.f32 %v274_v6, %v274_v6 }
  0xc4   : > { %v278_v8 = vmul.f32 %v277_v7, %v274_v6 }
  0xc6   : > { %v279_v9 = vmul.f32 0.044715, %v278_v8 }
  0xc7   : > { %v275_v10 = vpop.f32.mrf.mxu0 }
  0xc8   : > { %v280_v11 = vadd.f32 %v279_v9, %v274_v6 }
  0xca   : > { %v281_v12 = vmul.f32 0.7978846, %v280_v11 }
  0xcc   : > { %460 = vtanh.f32 %v281_v12 }
  0xd2   : > { %v461_v13 = vpop.eup %460 }
  0xd3   : > { %v283_v14 = vadd.f32 1.0, %v461_v13 }
  0xd5   : > { %v284_v15 = vmul.f32 0.5, %v283_v14 }
  0xd7   : > { %v285_v16 = vmul.f32 %v284_v15, %v274_v6 }
  0xd9   : > { %287 = vst.msk [vmem:[%s236_s28] sm:$0x7f] %vm286_vm1, %v285_v16 }
  0xda PF: > { %p14_p8 = scmp.ge.s32.totalorder %s640_s16, 4   ;;  %s769_s12 = smov %s586_s13 }
  0xdb   : > { %s770_s13 = smov %s590_s14  ;;  %s771_s14 = smov %s651_s19 }
  0xdc   : > { %s772_s15 = smov %s640_s16  ;;  %16 = sbr.rel (!%p14_p8) target bundleno = 4 (0x4), region = 87 }
  0xe1   :  { %307 = vsyncpa [#allocation3], 1 }
  0xe2   :  { %309 = vsyncpa [#allocation3 + $0x1], 1 }
  0xe3   :  { %310 = vsyncpa [#allocation5], 1 }

</bundles_post_ra>
